<compile_context>
chip_gen: v6e
topology: v6e:2x2x1
jax: 0.10.0
libtpu: 0.0.40
codegen_flags: <defaults>
</compile_context>

<pallas_src>
import functools

import jax
import jax.numpy as jnp
from jax.experimental import pallas as pl
from jax.experimental.pallas import tpu as pltpu


def _round_up(x, m):
    return ((x + m - 1) // m) * m


def _focal_loss_kernel(x_ref, t_ref, w_ref, num_ref, den_ref,
                       acc_n_ref, acc_d_ref, *, gamma, ignore_index):
    t_idx = pl.program_id(1)

    @pl.when(t_idx == 0)
    def _init():
        acc_n_ref[...] = jnp.zeros_like(acc_n_ref)
        acc_d_ref[...] = jnp.zeros_like(acc_d_ref)

    x = x_ref[...].astype(jnp.float32)          # (tn, Cp)
    t = t_ref[...]                              # (tn, 1) int32
    w = w_ref[...].astype(jnp.float32)          # (1, Cp)

    # --- log-sum-exp over classes (lane axis): the only full-tile exp ---
    m = jnp.max(x, axis=1, keepdims=True)                     # (tn, 1)
    sumexp = jnp.sum(jnp.exp(x - m), axis=1, keepdims=True)   # (tn, 1)

    # --- gather x[i, t_i] and weight[t_i] via one-hot mask (no gather op) ---
    col = jax.lax.broadcasted_iota(jnp.int32, x.shape, 1)     # (tn, Cp)
    onehot = (col == t).astype(jnp.float32)                   # (tn, Cp)
    x_t = jnp.sum(onehot * x, axis=1, keepdims=True)          # (tn, 1)
    w_t = jnp.sum(onehot * w, axis=1, keepdims=True)          # (tn, 1)

    valid_b = t != ignore_index                               # (tn, 1) bool
    valid = valid_b.astype(jnp.float32)
    # Ignored / padded rows never match the one-hot; substitute a benign value
    # so their (discarded) focal term stays finite before being zeroed out.
    x_t = jnp.where(valid_b, x_t, m)

    # --- focal modulation on the gathered column only (O(tn) transcendentals) ---
    logpt_t = x_t - m - jnp.log(sumexp)                       # (tn, 1)
    pt_t = jnp.exp(logpt_t)
    one_minus = 1.0 - pt_t
    g = float(gamma)
    if g == 0.0:
        fac = jnp.ones_like(one_minus)
    elif g == float(int(g)) and 0 < int(g) <= 8:
        # integer-gamma fast path: repeated VPU multiplies, no exp/log pow
        fac = one_minus
        for _ in range(int(g) - 1):
            fac = fac * one_minus
    else:
        fac = one_minus ** g
    focal_t = fac * logpt_t                                   # (tn, 1)

    wv = w_t * valid
    # per-step: pure vector adds into VMEM scratch (no scalar reductions here)
    acc_n_ref[...] += -focal_t * wv
    acc_d_ref[...] += wv

    @pl.when(t_idx == pl.num_programs(1) - 1)
    def _finalize():
        num_ref[...] = jnp.sum(acc_n_ref[...]).reshape((1, 1, 1))
        den_ref[...] = jnp.sum(acc_d_ref[...]).reshape((1, 1, 1))


def focal_loss(input_, target, weight=None, *, gamma=2, ignore_index=-100,
               tn=None, n_parallel=2):
    """input_: [N, C] float (f32/bf16), target: [N] int, weight: [C] float or None."""
    N, C = input_.shape
    Cp = _round_up(C, 128)                      # lane-pad classes to full vregs
    P = int(n_parallel)                         # leading "parallel" axis (v7x: 2 TCs)

    if tn is None:
        # Double-buffered logits tile is the dominant VMEM user; keep it well
        # under the default scoped VMEM limit on v5e (16 MiB) / v6e / v7x.
        budget_bytes = 8 * 1024 * 1024
        itemsize = jnp.dtype(input_.dtype).itemsize
        tn = budget_bytes // (2 * Cp * itemsize)
    per_core_rows = _round_up(-(-N // P), 8)    # don't tile past each core's share
    tn = max(8, min(1024, int(tn), per_core_rows))
    tn = (tn // 8) * 8

    N_pad = _round_up(N, P * tn)
    T = N_pad // (P * tn)                       # reduction steps per core

    # Padding: padded class lanes get -1e30 so they never win the max and add ~0
    # to the LSE; padded rows get target == ignore_index so they contribute
    # exactly 0 to both numerator and denominator.
    x_p = input_
    if N_pad != N or Cp != C:
        x_p = jnp.pad(input_, ((0, N_pad - N), (0, Cp - C)),
                      constant_values=-1e30)
    t_p = jnp.full((N_pad, 1), ignore_index, dtype=jnp.int32)
    t_p = t_p.at[:N, 0].set(target.astype(jnp.int32))
    if weight is None:
        w_row = jnp.ones((C,), jnp.float32)
    else:
        w_row = weight.astype(jnp.float32)
    w2d = jnp.zeros((1, Cp), jnp.float32).at[0, :C].set(w_row)

    kernel = functools.partial(
        _focal_loss_kernel, gamma=float(gamma), ignore_index=int(ignore_index))

    num, den = pl.pallas_call(
        kernel,
        out_shape=(
            jax.ShapeDtypeStruct((P, 1, 1), jnp.float32),
            jax.ShapeDtypeStruct((P, 1, 1), jnp.float32),
        ),
        grid_spec=pltpu.PrefetchScalarGridSpec(
            num_scalar_prefetch=0,
            grid=(P, T),
            in_specs=[
                pl.BlockSpec((tn, Cp), lambda p, t: (p * T + t, 0)),  # logits tile
                pl.BlockSpec((tn, 1), lambda p, t: (p * T + t, 0)),   # targets tile
                pl.BlockSpec((1, Cp), lambda p, t: (0, 0)),           # class weights (resident)
            ],
            out_specs=[
                pl.BlockSpec((1, 1, 1), lambda p, t: (p, 0, 0)),      # per-core numerator
                pl.BlockSpec((1, 1, 1), lambda p, t: (p, 0, 0)),      # per-core denominator
            ],
            scratch_shapes=[
                pltpu.VMEM((tn, 1), jnp.float32),   # numerator row partials
                pltpu.VMEM((tn, 1), jnp.float32),   # denominator row partials
            ],
        ),
        compiler_params=pltpu.CompilerParams(
            dimension_semantics=("parallel", "arbitrary"),
        ),
    )(x_p, t_p, w2d)

    # NOTE: if every target == ignore_index, den == 0 and this is NaN/Inf,
    # matching PyTorch nll_loss behavior.
    return (jnp.sum(num) / jnp.sum(den)).astype(jnp.float32)


def focal_loss_ref(input_, target, weight=None, *, gamma=2, ignore_index=-100):
    """Pure-JAX reference mirroring the PyTorch forward."""
    N, C = input_.shape
    if weight is None:
        weight = jnp.ones((C,), jnp.float32)
    x = input_.astype(jnp.float32)
    logpt = jax.nn.log_softmax(x, axis=1)
    pt = jnp.exp(logpt)
    logpt = (1.0 - pt) ** gamma * logpt
    valid = (target != ignore_index)
    safe_t = jnp.where(valid, target, 0)
    picked = jnp.take_along_axis(logpt, safe_t[:, None], axis=1)[:, 0]
    w_t = weight[safe_t]
    validf = valid.astype(jnp.float32)
    num = jnp.sum(-picked * w_t * validf)
    den = jnp.sum(w_t * validf)
    return num / den


if __name__ == "__main__":
    key = jax.random.PRNGKey(0)
    k1, k2, k3 = jax.random.split(key, 3)

    N, C = 16, 32
    logits = jax.random.normal(k1, (N, C), dtype=jnp.float32)
    target = jax.random.randint(k2, (N,), 0, C, dtype=jnp.int32)
    target = target.at[3].set(-100)          # exercise ignore_index
    cls_w = jax.random.uniform(k3, (C,), minval=0.5, maxval=1.5, dtype=jnp.float32)

    # default module config: weight=None, gamma=2, ignore_index=-100
    loss = focal_loss(logits, target, weight=None, gamma=2, ignore_index=-100)
    loss = jax.block_until_ready(loss)
    ref = focal_loss_ref(logits, target, weight=None, gamma=2, ignore_index=-100)
    assert jnp.allclose(loss, ref, rtol=1e-5, atol=1e-6), (loss, ref)

    # weighted variant
    loss_w = focal_loss(logits, target, weight=cls_w, gamma=2, ignore_index=-100)
    loss_w = jax.block_until_ready(loss_w)
    ref_w = focal_loss_ref(logits, target, weight=cls_w, gamma=2, ignore_index=-100)
    assert jnp.allclose(loss_w, ref_w, rtol=1e-5, atol=1e-6), (loss_w, ref_w)

    print("KERNEL_OK")
</pallas_src>

<mosaic_0001>
module attributes {stable_mosaic.version = 11 : i64} {
  func.func @_focal_loss_kernel(%arg0: i32, %arg1: i32, %arg2: memref<8x128xf32, #tpu.memory_space<vmem>>, %arg3: memref<8x1xi32, #tpu.memory_space<vmem>>, %arg4: memref<1x128xf32, #tpu.memory_space<vmem>>, %arg5: memref<1x1x1xf32, #tpu.memory_space<vmem>>, %arg6: memref<1x1x1xf32, #tpu.memory_space<vmem>>, %arg7: memref<8x1xf32, #tpu.memory_space<vmem>>, %arg8: memref<8x1xf32, #tpu.memory_space<vmem>>) attributes {dimension_semantics = [#tpu.dimension_semantics<parallel>, #tpu.dimension_semantics<arbitrary>], iteration_bounds = array<i64: 2, 1>, scalar_prefetch = 0 : i64, scratch_operands = 2 : i64, tpu.core_type = #tpu.core_type<tc>, window_params = [{transform_indices = @transform_0, window_bounds = array<i64: 8, 128>}, {transform_indices = @transform_1, window_bounds = array<i64: 8, 1>}, {pipeline_mode = #tpu.pipeline_mode<synchronous>, transform_indices = @transform_2, window_bounds = array<i64: 1, 128>}, {transform_indices = @transform_3, window_bounds = array<i64: 1, 1, 1>}, {transform_indices = @transform_4, window_bounds = array<i64: 1, 1, 1>}]} {
    %c0_i32 = arith.constant 0 : i32
    %0 = arith.cmpi eq, %arg1, %c0_i32 : i32
    %1 = arith.extui %0 : i1 to i32
    %c0_i32_0 = arith.constant 0 : i32
    %2 = arith.cmpi ne, %1, %c0_i32_0 : i32
    scf.if %2 {
      %cst_21 = arith.constant 0.000000e+00 : f32
      %51 = vector.broadcast %cst_21 : f32 to vector<8x1xf32>
      %c0_22 = arith.constant 0 : index
      %c0_23 = arith.constant 0 : index
      %52 = vector.load %arg7[%c0_22, %c0_23] : memref<8x1xf32, #tpu.memory_space<vmem>>, vector<8x1xf32>
      tpu.vector_store %arg7[%c0_22, %c0_23], %51 {strides = array<i32>} : memref<8x1xf32, #tpu.memory_space<vmem>>, vector<8x1xf32>,
      %cst_24 = arith.constant 0.000000e+00 : f32
      %53 = vector.broadcast %cst_24 : f32 to vector<8x1xf32>
      %c0_25 = arith.constant 0 : index
      %c0_26 = arith.constant 0 : index
      %54 = vector.load %arg8[%c0_25, %c0_26] : memref<8x1xf32, #tpu.memory_space<vmem>>, vector<8x1xf32>
      tpu.vector_store %arg8[%c0_25, %c0_26], %53 {strides = array<i32>} : memref<8x1xf32, #tpu.memory_space<vmem>>, vector<8x1xf32>,
    } else {
    }
    %c0 = arith.constant 0 : index
    %c0_1 = arith.constant 0 : index
    %3 = vector.load %arg2[%c0, %c0_1] : memref<8x128xf32, #tpu.memory_space<vmem>>, vector<8x128xf32>
    %c0_2 = arith.constant 0 : index
    %c0_3 = arith.constant 0 : index
    %4 = vector.load %arg3[%c0_2, %c0_3] : memref<8x1xi32, #tpu.memory_space<vmem>>, vector<8x1xi32>
    %c0_4 = arith.constant 0 : index
    %c0_5 = arith.constant 0 : index
    %5 = vector.load %arg4[%c0_4, %c0_5] : memref<1x128xf32, #tpu.memory_space<vmem>>, vector<1x128xf32>
    %cst = arith.constant dense<0xFF800000> : vector<8xf32>
    %6 = vector.multi_reduction <maximumf>, %3, %cst [1] : vector<8x128xf32> to vector<8xf32>
    %7 = vector.shape_cast %6 : vector<8xf32> to vector<8x1xf32>
    %8 = vector.broadcast %7 : vector<8x1xf32> to vector<8x128xf32>
    %9 = arith.subf %3, %8 : vector<8x128xf32>
    %10 = math.exp %9 : vector<8x128xf32>
    %cst_6 = arith.constant dense<0.000000e+00> : vector<8xf32>
    %11 = vector.multi_reduction <add>, %10, %cst_6 [1] : vector<8x128xf32> to vector<8xf32>
    %12 = vector.shape_cast %11 : vector<8xf32> to vector<8x1xf32>
    %13 = tpu.iota {dimensions = array<i32: 1>} : vector<8x128xi32>
    %14 = vector.broadcast %4 : vector<8x1xi32> to vector<8x128xi32>
    %15 = arith.cmpi eq, %13, %14 : vector<8x128xi32>
    %16 = arith.extui %15 : vector<8x128xi1> to vector<8x128xi32>
    %17 = arith.sitofp %16 : vector<8x128xi32> to vector<8x128xf32>
    %18 = arith.mulf %17, %3 : vector<8x128xf32>
    %cst_7 = arith.constant dense<0.000000e+00> : vector<8xf32>
    %19 = vector.multi_reduction <add>, %18, %cst_7 [1] : vector<8x128xf32> to vector<8xf32>
    %20 = vector.shape_cast %19 : vector<8xf32> to vector<8x1xf32>
    %21 = vector.broadcast %5 : vector<1x128xf32> to vector<8x128xf32>
    %22 = arith.mulf %17, %21 : vector<8x128xf32>
    %cst_8 = arith.constant dense<0.000000e+00> : vector<8xf32>
    %23 = vector.multi_reduction <add>, %22, %cst_8 [1] : vector<8x128xf32> to vector<8xf32>
    %24 = vector.shape_cast %23 : vector<8xf32> to vector<8x1xf32>
    %c-100_i32 = arith.constant -100 : i32
    %25 = vector.broadcast %c-100_i32 : i32 to vector<8x1xi32>
    %26 = arith.cmpi ne, %4, %25 : vector<8x1xi32>
    %27 = arith.extui %26 : vector<8x1xi1> to vector<8x1xi32>
    %28 = arith.sitofp %27 : vector<8x1xi32> to vector<8x1xf32>
    %29 = arith.select %26, %20, %7 : vector<8x1xi1>, vector<8x1xf32>
    %30 = arith.subf %29, %7 : vector<8x1xf32>
    %31 = math.log %12 : vector<8x1xf32>
    %32 = arith.subf %30, %31 : vector<8x1xf32>
    %33 = math.exp %32 : vector<8x1xf32>
    %cst_9 = arith.constant 1.000000e+00 : f32
    %34 = vector.broadcast %cst_9 : f32 to vector<8x1xf32>
    %35 = arith.subf %34, %33 : vector<8x1xf32>
    %36 = arith.mulf %35, %35 : vector<8x1xf32>
    %37 = arith.mulf %36, %32 : vector<8x1xf32>
    %38 = arith.mulf %24, %28 : vector<8x1xf32>
    %c0_10 = arith.constant 0 : index
    %c0_11 = arith.constant 0 : index
    %39 = vector.load %arg7[%c0_10, %c0_11] : memref<8x1xf32, #tpu.memory_space<vmem>>, vector<8x1xf32>
    %cst_12 = arith.constant 0.000000e+00 : f32
    %40 = vector.broadcast %cst_12 : f32 to vector<8x1xf32>
    %41 = arith.subf %40, %37 : vector<8x1xf32>
    %42 = arith.mulf %41, %38 : vector<8x1xf32>
    %43 = arith.addf %39, %42 : vector<8x1xf32>
    %c0_13 = arith.constant 0 : index
    %c0_14 = arith.constant 0 : index
    %44 = vector.load %arg7[%c0_13, %c0_14] : memref<8x1xf32, #tpu.memory_space<vmem>>, vector<8x1xf32>
    tpu.vector_store %arg7[%c0_13, %c0_14], %43 {strides = array<i32>} : memref<8x1xf32, #tpu.memory_space<vmem>>, vector<8x1xf32>,
    %c0_15 = arith.constant 0 : index
    %c0_16 = arith.constant 0 : index
    %45 = vector.load %arg8[%c0_15, %c0_16] : memref<8x1xf32, #tpu.memory_space<vmem>>, vector<8x1xf32>
    %46 = arith.addf %45, %38 : vector<8x1xf32>
    %c0_17 = arith.constant 0 : index
    %c0_18 = arith.constant 0 : index
    %47 = vector.load %arg8[%c0_17, %c0_18] : memref<8x1xf32, #tpu.memory_space<vmem>>, vector<8x1xf32>
    tpu.vector_store %arg8[%c0_17, %c0_18], %46 {strides = array<i32>} : memref<8x1xf32, #tpu.memory_space<vmem>>, vector<8x1xf32>,
    %c0_i32_19 = arith.constant 0 : i32
    %48 = arith.cmpi eq, %arg1, %c0_i32_19 : i32
    %49 = arith.extui %48 : i1 to i32
    %c0_i32_20 = arith.constant 0 : i32
    %50 = arith.cmpi ne, %49, %c0_i32_20 : i32
    scf.if %50 {
      %c0_21 = arith.constant 0 : index
      %c0_22 = arith.constant 0 : index
      %51 = vector.load %arg7[%c0_21, %c0_22] : memref<8x1xf32, #tpu.memory_space<vmem>>, vector<8x1xf32>
      %52 = vector.shape_cast %51 : vector<8x1xf32> to vector<1x8x1xf32>
      %cst_23 = arith.constant dense<0.000000e+00> : vector<1xf32>
      %53 = vector.multi_reduction <add>, %52, %cst_23 [1, 2] : vector<1x8x1xf32> to vector<1xf32>
      %54 = vector.shape_cast %53 : vector<1xf32> to vector<1x1x1xf32>
      %55 = vector.extract %54[0, 0, 0] : f32 from vector<1x1x1xf32>
      %56 = vector.broadcast %55 : f32 to vector<1x1x1xf32>
      %c0_24 = arith.constant 0 : index
      %c0_25 = arith.constant 0 : index
      %c0_26 = arith.constant 0 : index
      %57 = vector.load %arg5[%c0_24, %c0_25, %c0_26] : memref<1x1x1xf32, #tpu.memory_space<vmem>>, vector<1x1x1xf32>
      tpu.vector_store %arg5[%c0_24, %c0_25, %c0_26], %56 {strides = array<i32>} : memref<1x1x1xf32, #tpu.memory_space<vmem>>, vector<1x1x1xf32>,
      %c0_27 = arith.constant 0 : index
      %c0_28 = arith.constant 0 : index
      %58 = vector.load %arg8[%c0_27, %c0_28] : memref<8x1xf32, #tpu.memory_space<vmem>>, vector<8x1xf32>
      %59 = vector.shape_cast %58 : vector<8x1xf32> to vector<1x8x1xf32>
      %cst_29 = arith.constant dense<0.000000e+00> : vector<1xf32>
      %60 = vector.multi_reduction <add>, %59, %cst_29 [1, 2] : vector<1x8x1xf32> to vector<1xf32>
      %61 = vector.shape_cast %60 : vector<1xf32> to vector<1x1x1xf32>
      %62 = vector.extract %61[0, 0, 0] : f32 from vector<1x1x1xf32>
      %63 = vector.broadcast %62 : f32 to vector<1x1x1xf32>
      %c0_30 = arith.constant 0 : index
      %c0_31 = arith.constant 0 : index
      %c0_32 = arith.constant 0 : index
      %64 = vector.load %arg6[%c0_30, %c0_31, %c0_32] : memref<1x1x1xf32, #tpu.memory_space<vmem>>, vector<1x1x1xf32>
      tpu.vector_store %arg6[%c0_30, %c0_31, %c0_32], %63 {strides = array<i32>} : memref<1x1x1xf32, #tpu.memory_space<vmem>>, vector<1x1x1xf32>,
    } else {
    }
    return
  }
  func.func @transform_0(%arg0: i32, %arg1: i32) -> (i32, i32) {
    %c1_i32 = arith.constant 1 : i32
    %0 = arith.muli %arg0, %c1_i32 : i32
    %1 = arith.addi %0, %arg1 : i32
    %c0_i32 = arith.constant 0 : i32
    %c0_i32_0 = arith.constant 0 : i32
    return %1, %c0_i32 : i32, i32
  }
  func.func @transform_1(%arg0: i32, %arg1: i32) -> (i32, i32) {
    %c1_i32 = arith.constant 1 : i32
    %0 = arith.muli %arg0, %c1_i32 : i32
    %1 = arith.addi %0, %arg1 : i32
    %c0_i32 = arith.constant 0 : i32
    %c0_i32_0 = arith.constant 0 : i32
    return %1, %c0_i32 : i32, i32
  }
  func.func @transform_2(%arg0: i32, %arg1: i32) -> (i32, i32) {
    %c0_i32 = arith.constant 0 : i32
    %c0_i32_0 = arith.constant 0 : i32
    %c0_i32_1 = arith.constant 0 : i32
    return %c0_i32, %c0_i32_0 : i32, i32
  }
  func.func @transform_3(%arg0: i32, %arg1: i32) -> (i32, i32, i32) {
    %c0_i32 = arith.constant 0 : i32
    %c0_i32_0 = arith.constant 0 : i32
    %c0_i32_1 = arith.constant 0 : i32
    return %arg0, %c0_i32, %c0_i32_0 : i32, i32, i32
  }
  func.func @transform_4(%arg0: i32, %arg1: i32) -> (i32, i32, i32) {
    %c0_i32 = arith.constant 0 : i32
    %c0_i32_0 = arith.constant 0 : i32
    %c0_i32_1 = arith.constant 0 : i32
    return %arg0, %c0_i32, %c0_i32_0 : i32, i32, i32
  }
}

</mosaic_0001>

<bundles_post_ra>
// kernel: tpu_custom_call.1
= control target key start
LH: loop header
LB: loop body
LE: loop exit
PB: predicated region body
PF: predicated region fallthrough
CT: control target
= control target key end

     0   :  { %s525_s15 = smov 0   ;;  %s527_s16 = smov 0   ;;  %s578_s0 = inlined_call_operand.vmem [shape: f32[16,128], index: 0, kind: input, shape index: {}]   ;;  %s579_s1 = inlined_call_operand.vmem [shape: s32[16,1], index: 1, kind: input, shape index: {}]   ;;  %s580_s2 = inlined_call_operand.vmem [shape: f32[1,128], index: 2, kind: input, shape index: {}]   ;;  %s581_s3 = inlined_call_operand.vmem [shape: f32[2,1,1], index: 3, kind: output, shape index: {0}]   ;;  %s582_s4 = inlined_call_operand.vmem [shape: f32[2,1,1], index: 4, kind: output, shape index: {1}]  }
   0x1   :  { %s529_s17 = smov 0  }
   0x2 LB: > { %s27_s18 = sadd.s32 1, %s492_s16  ;;  %p429_p0 = scmp.ge.s32.totalorder %s496_s17, 1  ;;  %s496_s17 = sphi %s529_s17, %s15_s17   ;;  %s492_s16 = sphi %s527_s16, %s584_s16   ;;  %s488_s15 = sphi %s525_s15, %s583_s15  }
   0x3   : > { %p29_p1 = scmp.ge.s32.totalorder %s27_s18, 2  ;;  %p193_p2 = scmp.lt.s32.totalorder %s496_s17, 3 }
   0x5   : > { %s586_s18 = smov (%p29_p1, %s27_s18), 0  ;;  %p194_p3 = pnand %p429_p0, %p193_p2 }
   0x6   : > { %p226_p4 = scmp.lt.s32.totalorder (!%p194_p3), %s488_s15, 1 }
   0x7   : > { %197 = sbr.rel (%p194_p3) target bundleno = 571 (0x23b), region = 32 }
   0xc   : > { %v498_v0 = vmov 0   ;;  %s588_s15 = smov (!%p226_p4, %s488_s15), 1  ;;  %vm247_vm0 = vcmask 7168   ;;  %v499_v2 = vmov 0.0   ;;  %v260_v7 = vlaneseq  ;;  %v433_v13 = vld [vmem:[%s580_s2] ss:$0 sm:$0xff] }
   0xd   : > { %467 = vset.pattern.permute.xlu0 %v498_v0  ;;  %s430_s19 = sshll.u32 %s588_s15, 3  ;;  %248 = vst.msk [vmem:[#allocation2] sm:$0xff] %vm247_vm0, %v499_v2  ;;  %249 = vst.msk [vmem:[#allocation3] sm:$0xff] %vm247_vm0, %v499_v2  ;;  %s239_s30 = scalar_lea.vmem %s581_s3, %s588_s15  ;;  %vm318_vm3 = vcmask 0  }
   0xe   : > { %s229_s22 = scalar_lea.vmem %s578_s0, %s430_s19  ;;  %s235_s25 = scalar_lea.vmem %s579_s1, %s430_s19  ;;  %v261_v8 = vand.u32 127, %v260_v7 }
   0xf   : > { %v250_v1 = vld [vmem:[%s229_s22] sm:$0xff]  ;;  %s242_s8 = scalar_lea.vmem %s582_s4, %s588_s15 }
  0x10   : > { %253 = vmax.xlane.f32.xlu0 %v250_v1  ;;  %v251_v3 = vld [vmem:[%s235_s25] sm:$0xff] }
  0x11   : > { %vm280_vm2 = vcmp.ne.s32.totalorder %v251_v3, 4294967196 }
  0x12   : > { %v434_v17 = vsel %vm280_vm2, 1.0, %v499_v2 }
  0x14   : > { %v300_v18 = vld [vmem:[#allocation3] sm:$0xff]  ;;  %v294_v33 = vld [vmem:[#allocation2] sm:$0xff] }
  0x26   : > { %263 = vperm.xlu0 %467, %v251_v3  }
  0x99   : > { %v254_v4 = vpop.xlane.xlu0 %253 }
  0x9a   : > { %v255_v5 = vsub.f32 %v250_v1, %v254_v4 }
  0x9c   : > { %v256_v6 = vmul.f32 1.442695, %v255_v5 }
  0x9e   : > { %468 = vpow2.f32 %v256_v6 }
  0xa1   : > { %v264_v9 = vpop.permute.xlu0 %263 }
  0xa2   : > { %vm265_vm1 = vcmp.eq.s32.totalorder %v261_v8, %v264_v9 }
  0xa3   : > { %v432_v10 = vsel %vm265_vm1, 1.0, %v499_v2 }
  0xa4   : > { %v268_v12 = vmul.f32 %v432_v10, %v250_v1  ;;  %v277_v14 = vmul.f32 %v433_v13, %v432_v10 }
  0xab   : > { %v469_v11 = vpop.eup %468 }
  0xac   : > { %258 = vadd.xlane.f32.xlu1 %v469_v11 }
  0xb0   : > { %269 = vadd.xlane.f32.xlu1 %v268_v12 }
  0xb4   : > { %278 = vadd.xlane.f32.xlu1 %v277_v14 }
 0x135   : > { %v259_v15 = vpop.xlane.xlu1 %258 }
 0x136   : > { %470 = vlog2.f32 %v259_v15 }
 0x139   : > { %v270_v16 = vpop.xlane.xlu1 %269 }
 0x13a   : > { %v283_v22 = vsel %vm280_vm2, %v270_v16, %v254_v4 }
 0x13b   : > { %v284_v25 = vsub.f32 %v283_v22, %v254_v4 }
 0x13d   : > { %v279_v19 = vpop.xlane.xlu1 %278 }
 0x13e   : > { %v293_v20 = vmul.f32 %v434_v17, %v279_v19 }
 0x140   : > { %v301_v21 = vadd.f32 %v300_v18, %v293_v20 }
 0x142   : > { %302 = vst.msk [vmem:[#allocation3] sm:$0xff] %vm247_vm0, %v301_v21 }
 0x143   : > { %v471_v23 = vpop.eup %470 }
 0x144   : > { %v286_v24 = vmul.f32 0.6931472, %v471_v23 }
 0x146   : > { %v287_v26 = vsub.f32 %v284_v25, %v286_v24 }
 0x148   : > { %v288_v27 = vmul.f32 1.442695, %v287_v26 }
 0x149   : > { %v320_v38 = vld [vmem:[#allocation3] sm:$0xff] }
 0x14a   : > { %472 = vpow2.f32 %v288_v27  ;;  %v321_v39 = vsel %vm247_vm0, %v320_v38, 0.0 }
 0x157   : > { %v473_v28 = vpop.eup %472 }
 0x158   : > { %v290_v29 = vsub.f32 1.0, %v473_v28 }
 0x15a   : > { %v291_v30 = vmul.f32 %v290_v29, %v290_v29 }
 0x15c   : > { %v292_v31 = vmul.f32 %v291_v30, %v287_v26 }
 0x15e   : > { %v295_v32 = vsub.f32 0.0, %v292_v31 }
 0x160   : > { %v296_v34 = vmul.f32 %v295_v32, %v293_v20 }
 0x162   : > { %v297_v35 = vadd.f32 %v296_v34, %v294_v33 }
 0x164   : > { %299 = vst.msk [vmem:[#allocation2] sm:$0xff] %vm247_vm0, %v297_v35 }
 0x16b   : > { %v306_v36 = vld [vmem:[#allocation2] sm:$0xff] }
 0x16c   : > { %v307_v37 = vsel %vm247_vm0, %v306_v36, 0.0 }
 0x16d   : > { %308 = vadd.xlane.f32.xlu1 %v307_v37 }
 0x171   : > { %322 = vadd.xlane.f32.xlu1 %v321_v39 }
 0x1f6   : > { %v309_v40 = vpop.xlane.xlu1 %308 }
 0x1f7   : > { %v310_v41 = vrot.slane %v309_v40, 4 }
 0x1f9   : > { %v311_v42 = vadd.f32 %v310_v41, %v309_v40 }
 0x1fa   : > { %v323_v43 = vpop.xlane.xlu1 %322 }
 0x1fb   : > { %v312_v44 = vrot.slane %v311_v42, 2  ;;  %v324_v45 = vrot.slane %v323_v43, 4 }
 0x1fd   : > { %v325_v46 = vadd.f32 %v324_v45, %v323_v43  ;;  %v313_v47 = vadd.f32 %v312_v44, %v311_v42 }
 0x1ff   : > { %v326_v48 = vrot.slane %v325_v46, 2  ;;  %v314_v49 = vrot.slane %v313_v47, 1 }
 0x201   : > { %v327_v50 = vadd.f32 %v326_v48, %v325_v46  ;;  %v315_v51 = vadd.f32 %v314_v49, %v313_v47 }
 0x203   : > { %437 = vpush %v315_v51  ;;  %v328_v52 = vrot.slane %v327_v50, 1 }
 0x205   : > { %v329_v53 = vadd.f32 %v328_v52, %v327_v50 }
 0x207   : > { %439 = vpush %v329_v53 }
 0x234   : > { %s438_s5 = spop %437 }
 0x235   : > { %v317_v54 = vstv %s438_s5 }
 0x236   : > { %319 = vst.msk [vmem:[%s239_s30] sm:$0x1] %vm318_vm3, %v317_v54 }
 0x238   : > { %s440_s9 = spop %439 }
 0x239   : > { %v331_v55 = vstv %s440_s9 }
 0x23a   : > { %332 = vst.msk [vmem:[%s242_s8] sm:$0x1] %vm318_vm3, %v331_v55 }
 0x23b PF: > { %s15_s17 = sadd.s32 1, %s496_s17   ;;  %s583_s15 = smov %s492_s16 }
 0x23c   : > { %p12_p5 = scmp.ge.s32.totalorder %s15_s17, 4   ;;  %s584_s16 = smov %s586_s18 }
 0x23e   :  { %14 = sbr.rel (!%p12_p5) target bundleno = 2 (0x2), region = 85 }

</bundles_post_ra>
